<compile_context>
chip_gen: v5e
topology: v5e:2x2
jax: 0.10.0
libtpu: 0.0.40
codegen_flags: <defaults>
</compile_context>

<pallas_src>
import math
from functools import partial

import numpy as np
import jax
import jax.numpy as jnp
from jax.experimental import pallas as pl
from jax.experimental.pallas import tpu as pltpu


def _round_up(x, m):
    return ((x + m - 1) // m) * m


def _mean_pool_conv_kernel(x_ref, m_ref, w_ref, b_ref, o_ref, *, ksize, wpp, l_pad):
    # x_ref : (1, Cin, H*W)        f32  flattened input image (lane-dense, single HBM read)
    # m_ref : (H*W, NF_pad)        bf16 fused pool+pad+flatten matrix (VMEM resident, 0.25/0)
    # w_ref : (Cout_p, K*K*Cin)    bf16 conv weights, tap-major / channel-minor (VMEM resident)
    # b_ref : (Cout_p, 1)          f32  bias column
    # o_ref : (1, Cout_p, L_pad)   f32  output: flattened spatial (row stride Wpp) on lanes
    x16 = x_ref[0].astype(jnp.bfloat16)                                   # (Cin, H*W)

    # One MXU pass: 2x2 mean pool (+ the /4) + zero padding + row-major flatten with row
    # stride Wpp.  f[c, i*Wpp + j] == pooled_pad[c, i, j]; extra columns are zero.
    f = jnp.dot(x16, m_ref[...], preferred_element_type=jnp.float32)      # (Cin, NF_pad) f32

    # im2col without per-tap window copies: the slab for tap (dy, dx) is a static lane-offset
    # slice of the flattened padded image (offset dy*Wpp + dx), i.e. a cheap XLU lane rotation.
    pieces = []
    for dy in range(ksize):
        for dx in range(ksize):
            off = dy * wpp + dx
            pieces.append(f[:, off:off + l_pad])                          # (Cin, L_pad)
    rr = jnp.concatenate(pieces, axis=0).astype(jnp.bfloat16)             # (K*K*Cin, L_pad)

    # Single deep matmul: contraction over K*K*Cin, spatial lane-dense output.
    acc = jnp.dot(w_ref[...], rr, preferred_element_type=jnp.float32)     # (Cout_p, L_pad) f32
    o_ref[0] = (acc + b_ref[...]).astype(o_ref.dtype)


def mean_pool_conv_forward(x, weight, bias):
    """x: (B, Cin, H, W) f32; weight: (Cout, Cin, K, K); bias: (Cout,).
    Returns (B, Cout, H//2, W//2)."""
    B, cin, H, W = x.shape
    cout, _, K, _ = weight.shape
    assert H % 2 == 0 and W % 2 == 0 and K % 2 == 1
    hp, wp = H // 2, W // 2
    pad = (K - 1) // 2
    hpp, wpp = hp + 2 * pad, wp + 2 * pad

    LANE, SUBLANE = 128, 8
    cout_p = _round_up(cout, SUBLANE)                 # 8-aligned only (not 128) -> low write amp
    l_pad = _round_up(hp * wpp, LANE)                 # lane-dense flattened-spatial output width
    off_max = (K - 1) * wpp + (K - 1)                 # largest tap offset
    nf_pad = _round_up(off_max + l_pad, LANE)         # flattened padded pooled image width

    # ---- tiny trace-time constants (weights-like; no per-call activation passes) ----
    # Pool+pad+flatten matrix: M[h*W+w, i*Wpp+j] = 0.25 iff i == h//2+pad and j == w//2+pad.
    n = np.arange(H * W)
    h_idx, w_idx = n // W, n % W
    m = np.arange(nf_pad)
    i_idx, j_idx = m // wpp, m % wpp
    pool_np = 0.25 * ((i_idx[None, :] == (h_idx[:, None] // 2 + pad))
                      & (j_idx[None, :] == (w_idx[:, None] // 2 + pad)))
    pool_mat = jnp.asarray(pool_np, dtype=jnp.bfloat16)        # 0.25 / 0.0 are exact in bf16

    # Conv weights (Cout, Cin, K, K) -> (Cout_p, K*K*Cin), tap-major / channel-minor (matches rr).
    w_mat = jnp.transpose(weight, (0, 2, 3, 1)).reshape(cout, K * K * cin)
    w_mat = jnp.pad(w_mat, ((0, cout_p - cout), (0, 0))).astype(jnp.bfloat16)
    b_col = jnp.pad(bias, (0, cout_p - cout)).reshape(cout_p, 1).astype(jnp.float32)

    # Free contiguous reshape: the kernel reads the input exactly once, lane-dense.
    x_flat = x.reshape(B, cin, H * W)

    kernel = partial(_mean_pool_conv_kernel, ksize=K, wpp=wpp, l_pad=l_pad)

    flops = 2 * B * (cin * H * W * nf_pad + cout_p * K * K * cin * l_pad)
    bytes_accessed = (x_flat.size * 4 + pool_mat.size * 2 + w_mat.size * 2
                      + b_col.size * 4 + B * cout_p * l_pad * 4)
    cost = pl.CostEstimate(flops=flops, transcendentals=0, bytes_accessed=bytes_accessed)

    out_flat = pl.pallas_call(
        kernel,
        out_shape=jax.ShapeDtypeStruct((B, cout_p, l_pad), x.dtype),
        grid=(B,),
        in_specs=[
            pl.BlockSpec((1, cin, H * W), lambda b: (b, 0, 0)),
            pl.BlockSpec((H * W, nf_pad), lambda b: (0, 0)),             # resident pooling matrix
            pl.BlockSpec((cout_p, K * K * cin), lambda b: (0, 0)),       # resident weights
            pl.BlockSpec((cout_p, 1), lambda b: (0, 0)),                 # resident bias
        ],
        out_specs=pl.BlockSpec((1, cout_p, l_pad), lambda b: (b, 0, 0)),
        compiler_params=pltpu.CompilerParams(dimension_semantics=("parallel",)),
        cost_estimate=cost,
    )(x_flat, pool_mat, w_mat, b_col)

    # Strip channel padding, junk columns (row stride Wpp) and the padded tail; back to NCHW.
    out = out_flat[:, :cout, :hp * wpp].reshape(B, cout, hp, wpp)[..., :wp]
    return out


def _reference(x, weight, bias):
    pooled = 0.25 * (x[..., ::2, ::2] + x[..., 1::2, ::2]
                     + x[..., ::2, 1::2] + x[..., 1::2, 1::2])
    pad = (weight.shape[-1] - 1) // 2
    out = jax.lax.conv_general_dilated(
        pooled, weight, window_strides=(1, 1),
        padding=((pad, pad), (pad, pad)),
        dimension_numbers=("NCHW", "OIHW", "NCHW"))
    return out + bias.reshape(1, -1, 1, 1)


if __name__ == "__main__":
    B, cin, H, W = 2, 4, 16, 16
    cout, K = 8, 3

    root = jax.random.PRNGKey(0)
    kx, kw, kb = jax.random.split(root, 3)
    x = jax.random.normal(kx, (B, cin, H, W), dtype=jnp.float32)
    # Conv2d-style uniform init (exact init scheme is irrelevant to the kernel itself).
    s = 1.0 / math.sqrt(cin * K * K)
    weight = jax.random.uniform(kw, (cout, cin, K, K), minval=-s, maxval=s, dtype=jnp.float32)
    bias = jax.random.uniform(kb, (cout,), minval=-s, maxval=s, dtype=jnp.float32)

    out = mean_pool_conv_forward(x, weight, bias)
    out = jax.block_until_ready(out)

    assert out.shape == (B, cout, H // 2, W // 2), out.shape
    assert out.dtype == jnp.float32

    ref = _reference(x, weight, bias)
    err = float(jnp.max(jnp.abs(out - ref)))
    assert jnp.allclose(out, ref, rtol=2e-2, atol=2e-2), err

    print("KERNEL_OK")
</pallas_src>

<mosaic_0001>
module attributes {stable_mosaic.version = 11 : i64} {
  func.func @_mean_pool_conv_kernel(%arg0: i32, %arg1: memref<1x4x256xf32, #tpu.memory_space<vmem>>, %arg2: memref<256x256xbf16, #tpu.memory_space<vmem>>, %arg3: memref<8x36xbf16, #tpu.memory_space<vmem>>, %arg4: memref<8x1xf32, #tpu.memory_space<vmem>>, %arg5: memref<1x8x128xf32, #tpu.memory_space<vmem>>) attributes {dimension_semantics = [#tpu.dimension_semantics<parallel>], iteration_bounds = array<i64: 2>, scalar_prefetch = 0 : i64, scratch_operands = 0 : i64, tpu.core_type = #tpu.core_type<tc>, window_params = [{transform_indices = @transform_0, window_bounds = array<i64: 1, 4, 256>}, {pipeline_mode = #tpu.pipeline_mode<synchronous>, transform_indices = @transform_1, window_bounds = array<i64: 256, 256>}, {pipeline_mode = #tpu.pipeline_mode<synchronous>, transform_indices = @transform_2, window_bounds = array<i64: 8, 36>}, {pipeline_mode = #tpu.pipeline_mode<synchronous>, transform_indices = @transform_3, window_bounds = array<i64: 8, 1>}, {transform_indices = @transform_4, window_bounds = array<i64: 1, 8, 128>}]} {
    %c0 = arith.constant 0 : index
    %c0_0 = arith.constant 0 : index
    %c0_1 = arith.constant 0 : index
    %0 = vector.load %arg1[%c0, %c0_0, %c0_1] : memref<1x4x256xf32, #tpu.memory_space<vmem>>, vector<1x4x256xf32>
    %1 = vector.shape_cast %0 : vector<1x4x256xf32> to vector<4x256xf32>
    %2 = arith.truncf %1 : vector<4x256xf32> to vector<4x256xbf16>
    %c0_2 = arith.constant 0 : index
    %c0_3 = arith.constant 0 : index
    %3 = vector.load %arg2[%c0_2, %c0_3] : memref<256x256xbf16, #tpu.memory_space<vmem>>, vector<256x256xbf16>
    %cst = arith.constant dense<0.000000e+00> : vector<4x256xf32>
    %4 = tpu.matmul %2, %3, %cst {dimension_numbers = #tpu.dot_dimension_numbers<[1], [0], [0], [1], [0, 0, 1, 1], [], []>} : vector<4x256xbf16>, vector<256x256xbf16>, vector<4x256xf32> -> vector<4x256xf32>
    %5 = vector.extract_strided_slice %4 {offsets = [0, 0], sizes = [4, 128], strides = [1, 1]} : vector<4x256xf32> to vector<4x128xf32>
    %6 = vector.extract_strided_slice %4 {offsets = [0, 1], sizes = [4, 128], strides = [1, 1]} : vector<4x256xf32> to vector<4x128xf32>
    %7 = vector.extract_strided_slice %4 {offsets = [0, 2], sizes = [4, 128], strides = [1, 1]} : vector<4x256xf32> to vector<4x128xf32>
    %8 = vector.extract_strided_slice %4 {offsets = [0, 10], sizes = [4, 128], strides = [1, 1]} : vector<4x256xf32> to vector<4x128xf32>
    %9 = vector.extract_strided_slice %4 {offsets = [0, 11], sizes = [4, 128], strides = [1, 1]} : vector<4x256xf32> to vector<4x128xf32>
    %10 = vector.extract_strided_slice %4 {offsets = [0, 12], sizes = [4, 128], strides = [1, 1]} : vector<4x256xf32> to vector<4x128xf32>
    %11 = vector.extract_strided_slice %4 {offsets = [0, 20], sizes = [4, 128], strides = [1, 1]} : vector<4x256xf32> to vector<4x128xf32>
    %12 = vector.extract_strided_slice %4 {offsets = [0, 21], sizes = [4, 128], strides = [1, 1]} : vector<4x256xf32> to vector<4x128xf32>
    %13 = vector.extract_strided_slice %4 {offsets = [0, 22], sizes = [4, 128], strides = [1, 1]} : vector<4x256xf32> to vector<4x128xf32>
    %14 = tpu.concatenate %5, %6, %7, %8, %9, %10, %11, %12, %13 in 0 : vector<4x128xf32>, vector<4x128xf32>, vector<4x128xf32>, vector<4x128xf32>, vector<4x128xf32>, vector<4x128xf32>, vector<4x128xf32>, vector<4x128xf32>, vector<4x128xf32> -> vector<36x128xf32>
    %15 = arith.truncf %14 : vector<36x128xf32> to vector<36x128xbf16>
    %c0_4 = arith.constant 0 : index
    %c0_5 = arith.constant 0 : index
    %16 = vector.load %arg3[%c0_4, %c0_5] : memref<8x36xbf16, #tpu.memory_space<vmem>>, vector<8x36xbf16>
    %cst_6 = arith.constant dense<0.000000e+00> : vector<8x128xf32>
    %17 = tpu.matmul %16, %15, %cst_6 {dimension_numbers = #tpu.dot_dimension_numbers<[1], [0], [0], [1], [0, 0, 1, 1], [], []>} : vector<8x36xbf16>, vector<36x128xbf16>, vector<8x128xf32> -> vector<8x128xf32>
    %c0_7 = arith.constant 0 : index
    %c0_8 = arith.constant 0 : index
    %18 = vector.load %arg4[%c0_7, %c0_8] : memref<8x1xf32, #tpu.memory_space<vmem>>, vector<8x1xf32>
    %19 = vector.broadcast %18 : vector<8x1xf32> to vector<8x128xf32>
    %20 = arith.addf %17, %19 : vector<8x128xf32>
    %c0_9 = arith.constant 0 : index
    %c0_10 = arith.constant 0 : index
    %c0_11 = arith.constant 0 : index
    %21 = vector.load %arg5[%c0_9, %c0_10, %c0_11] : memref<1x8x128xf32, #tpu.memory_space<vmem>>, vector<1x8x128xf32>
    %22 = vector.shape_cast %21 : vector<1x8x128xf32> to vector<8x128xf32>
    %23 = vector.shape_cast %20 : vector<8x128xf32> to vector<1x8x128xf32>
    tpu.vector_store %arg5[%c0_9, %c0_10, %c0_11], %23 {strides = array<i32>} : memref<1x8x128xf32, #tpu.memory_space<vmem>>, vector<1x8x128xf32>,
    return
  }
  func.func @transform_0(%arg0: i32) -> (i32, i32, i32) {
    %c0_i32 = arith.constant 0 : i32
    %c0_i32_0 = arith.constant 0 : i32
    %c0_i32_1 = arith.constant 0 : i32
    return %arg0, %c0_i32, %c0_i32_0 : i32, i32, i32
  }
  func.func @transform_1(%arg0: i32) -> (i32, i32) {
    %c0_i32 = arith.constant 0 : i32
    %c0_i32_0 = arith.constant 0 : i32
    %c0_i32_1 = arith.constant 0 : i32
    return %c0_i32, %c0_i32_0 : i32, i32
  }
  func.func @transform_2(%arg0: i32) -> (i32, i32) {
    %c0_i32 = arith.constant 0 : i32
    %c0_i32_0 = arith.constant 0 : i32
    %c0_i32_1 = arith.constant 0 : i32
    return %c0_i32, %c0_i32_0 : i32, i32
  }
  func.func @transform_3(%arg0: i32) -> (i32, i32) {
    %c0_i32 = arith.constant 0 : i32
    %c0_i32_0 = arith.constant 0 : i32
    %c0_i32_1 = arith.constant 0 : i32
    return %c0_i32, %c0_i32_0 : i32, i32
  }
  func.func @transform_4(%arg0: i32) -> (i32, i32, i32) {
    %c0_i32 = arith.constant 0 : i32
    %c0_i32_0 = arith.constant 0 : i32
    %c0_i32_1 = arith.constant 0 : i32
    return %arg0, %c0_i32, %c0_i32_0 : i32, i32, i32
  }
}

</mosaic_0001>

<bundles_post_ra>
// kernel: tpu_custom_call.1
= control target key start
LH: loop header
LB: loop body
LE: loop exit
PB: predicated region body
PF: predicated region fallthrough
CT: control target
= control target key end

     0   :  { %9 = vsyncpa [#allocation3], 0  ;;  %s1294_s0 = inlined_call_operand.hbm [shape: f32[2,4,256], index: 0, kind: input, shape index: {}]   ;;  %s1295_s1 = inlined_call_operand.hbm [shape: bf16[256,256], index: 1, kind: input, shape index: {}]   ;;  %s1296_s2 = inlined_call_operand.vmem [shape: bf16[8,36], index: 2, kind: input, shape index: {}]   ;;  %s1297_s3 = inlined_call_operand.vmem [shape: f32[8,1], index: 3, kind: input, shape index: {}]   ;;  %s1298_s4 = inlined_call_operand.hbm [shape: f32[2,8,128], index: 4, kind: output, shape index: {}]  }
   0x1   :  { %11 = vsyncpa [#allocation3 + $0x1], 0 }
   0x2   :  { %12 = vsyncpa [#allocation6], 0 }
   0x3   :  { %13 = vsyncpa [#allocation4], 0 }
   0x4   :  { %15 = vsyncpa [#allocation4 + $0x1], 0  ;;  %s1136_s15 = smov 0   ;;  %s1138_s16 = smov 0  }
   0x5   :  { %s1140_s17 = smov 0   ;;  %s1142_s18 = smov 0  }
   0x6 LB: > { %s152_s21 = sshll.u32 %s1295_s1, 4  ;;  %s1160_s22 = sadd.s32 4294967295, %s1097_s18   ;;  %s1097_s18 = sphi %s1142_s18, %s1308_s18   ;;  %s1093_s17 = sphi %s1140_s17, %s1307_s17   ;;  %s1089_s16 = sphi %s1138_s16, %s1306_s16   ;;  %s1085_s15 = sphi %s1136_s15, %s1305_s15   ;;  %s153_s21 = int_to_ptr.hbm [resolvable:$true] %s152_s21 }
   0x7   : > { %p681_p0 = scmp.ge.s32.totalorder %s1097_s18, 1  ;;  %p42_p1 = scmp.eq.s32.totalorder %s1160_s22, 0 }
   0x8   : > { %p141_p2 = scmp.lt.s32.totalorder %s1097_s18, 3  ;;  %s1099_s24 = smov [#allocation5]  }
   0x9   : > { %s154_s25 = sshll.u32 %s1099_s24, 4  ;;  %s1100_s26 = smov 128   ;;  %s155_s25 = int_to_ptr.vmem [resolvable:$true] %s154_s25 }
   0xa   : > { %p1165_p3 = pnand %p681_p0, %p141_p2  ;;  %s1101_s27 = smov 8  }
   0xb   : > { %s680_s28 = sadd.s32 4294967294, %s1097_s18   ;;  %s1176_s29 = sadd.s32 1, %s1097_s18  }
   0xc   : > { %p865_p4 = pneg %p1165_p3  ;;  %s28_s30 = sadd.s32 1, %s1093_s17 }
   0xd   : > { %s25_s5 = ssub.s32 %s1097_s18, %s1176_s29  ;;  %p35_p7 = scmp.ne.s32.totalorder %s1093_s17, %s1089_s16 }
   0xe   : > { %p866_p6 = pnand %p865_p4, %p42_p1  ;;  %p26_p8 = scmp.eq.s32.totalorder %s25_s5, 0 }
   0xf   : > { %p36_p9 = scmp.eq.s32.totalorder %s1097_s18, 0  ;;  %p41_p10 = scmp.ne.s32.totalorder %s1089_s16, %s1085_s15 }
  0x10   : > { %868 = dma.hbm_to_vmem [thread:$0]  (!%p866_p6), %s153_s21, 4096, %s155_s25, [#allocation6], %s1100_s26, %s1100_s26, %s1101_s27  }
  0x11   : > { %p128_p11 = scmp.eq.s32.totalorder %s1160_s22, 1  ;;  %p1192_p12 = por %p42_p1, %p41_p10 }
  0x12   : > { %s1188_s6 = scalar_select %p26_p8, %s1093_s17, %s28_s30  }
  0x13   : > { %p1196_p13 = por %p128_p11, %p35_p7  ;;  %p134_p0 = scmp.eq.s32.totalorder %s680_s28, 1 }
  0x14   : > { %p37_p2 = por %p36_p9, %p35_p7  ;;  %s174_s9 = sand.u32 1, %s1093_s17  }
  0x15   : > { %p1201_p4 = por %p134_p0, %p41_p10  ;;  %p878_p6 = scmp.lt.s32.totalorder %s1097_s18, 2 }
  0x16   : > { %s684_s11 = sshll.u32 %s174_s9, 3  ;;  %s824_s12 = sshll.u32 %s1097_s18, 3 }
  0x17   : > { %s183_s19 = scalar_lea.hbm %s1294_s0, %s824_s12  ;;  %s178_s21 = scalar_lea.vmem [#allocation2], %s684_s11 }
  0x18   : > { %s185_s20 = sshll.u32 %s183_s19, 4  ;;  %s187_s24 = sshll.u32 %s178_s21, 4  ;;  %s186_s20 = int_to_ptr.hbm [resolvable:$true] %s185_s20  ;;  %s188_s24 = int_to_ptr.vmem [resolvable:$true] %s187_s24 }
  0x19   : > { %p1210_p8 = pnand %p878_p6, %p37_p2  ;;  %s175_s26 = scalar_lea.sflag [#allocation3], %s174_s9 }
  0x1a   : > { %s997_s27 = sshra.s32 %s186_s20, 4  ;;  %s1004_s11 = scalar_lea.hbm %s1294_s0, 16  ;;  %s998_s27 = int_to_ptr.hbm [resolvable:$true] %s997_s27 }
  0x1b   : > { %s999_s28 = scalar_lea.hbm %s998_s27, 8  ;;  %p1001_p9 = pneg %p1210_p8 }
  0x1c   : > { %p1000_p7 = scmp.ne.s32.totalorder %s998_s27, %s999_s28  ;;  %p1005_p0 = scmp.lt.s32.totalorder %s998_s27, %s1294_s0 }
  0x1d   : > { %p1006_p2 = scmp.lt.s32.totalorder %s1004_s11, %s999_s28 }
  0x1e   : > { %p1002_p10 = pnand %p1001_p9, %p1000_p7 }
  0x1f   : > { %p1007_p6 = por %p1006_p2, %p1005_p0 }
  0x20   : > { %p1003_p11 = pneg %p1002_p10 }
  0x22   : > { %p1008_p5 = pnand %p1007_p6, %p1003_p11 }
  0x24   : > { %1011 = shalt.err (!%p1008_p5)
}
  0x25   : > { %872 = dma.hbm_to_vmem [thread:$0]  (!%p1210_p8), %s186_s20, 128, %s188_s24, %s175_s26  }
  0x26   : > { %196 = sbr.rel (%p1165_p3) target bundleno = 493 (0x1ed), region = 36  ;;  %s1227_s9 = sand.u32 (!%p1165_p3), 1, %s1089_s16  }
  0x27   : > { %s688_s14 = sshll.u32 (!%p1165_p3), %s1227_s9, 3  ;;  %s199_s19 = scalar_lea.sflag (!%p1165_p3), [#allocation3], %s1227_s9 }
  0x28   : > { %s1233_s21 = scalar_lea.vmem (!%p1165_p3), [#allocation2], %s688_s14 }
  0x2b   : > { %1072 = dma.done.wait (%p1192_p12), %s199_s19, 128  }
  0x2c   : > { %1074 = vsyncadd (%p1192_p12), %s199_s19, 4294967168 }
  0x2d   : > { %1076 = dma.done.wait (%p42_p1), [#allocation6], 4096  }
  0x2e   : > { %1078 = vsyncadd (%p42_p1), [#allocation6], 4294963200  ;;  %v749_v0 = vld [vmem:[#allocation5 + $0x70] sm:$0xf]  ;;  %v840_v1 = vld [vmem:[#allocation5 + $0x74] sm:$0xf0] }
  0x2f   : > { %v813_v2 = vld [vmem:[#allocation5 + $0xf0] sm:$0xf]  ;;  %v750_v3 = vor.u32 %v840_v1, %v749_v0  ;;  %v856_v4 = vld [vmem:[#allocation5 + $0xf4] sm:$0xf0]  ;;  %v839_v5 = vld [vmem:[#allocation5 + $0x74] sm:$0xf] }
  0x30   : > { %v751_v6 = vld [vmem:[#allocation5 + $0x78] sm:$0xf0]  ;;  %v814_v7 = vor.u32 %v856_v4, %v813_v2  ;;  %v855_v9 = vld [vmem:[#allocation5 + $0xf4] sm:$0xf]  ;;  %v741_v11 = vld [vmem:[#allocation5 + $0x60] sm:$0xf] }
  0x31   : > { %v754_v8 = vor.u32 %v839_v5, %v751_v6  ;;  %v815_v10 = vld [vmem:[#allocation5 + $0xf8] sm:$0xf0]  ;;  %435 = vmatpush.bf16.msra.mxu0 %v750_v3  ;;  %v838_v13 = vld [vmem:[#allocation5 + $0x64] sm:$0xf0]  ;;  %v805_v14 = vld [vmem:[#allocation5 + $0xe0] sm:$0xf] }
  0x32   : > { %v818_v12 = vor.u32 %v855_v9, %v815_v10  ;;  %v854_v15 = vld [vmem:[#allocation5 + $0xe4] sm:$0xf0]  ;;  %448 = vmatpush.bf16.msra.mxu1 %v814_v7  ;;  %v742_v16 = vor.u32 %v838_v13, %v741_v11  ;;  %v837_v18 = vld [vmem:[#allocation5 + $0x64] sm:$0xf]  ;;  %v743_v19 = vld [vmem:[#allocation5 + $0x68] sm:$0xf0] }
  0x33   : > { %461 = vmatpush.bf16.msra.mxu2 %v754_v8  ;;  %v806_v17 = vor.u32 %v854_v15, %v805_v14  ;;  %v853_v20 = vld [vmem:[#allocation5 + $0xe4] sm:$0xf]  ;;  %v746_v21 = vor.u32 %v837_v18, %v743_v19  ;;  %v807_v22 = vld [vmem:[#allocation5 + $0xe8] sm:$0xf0]  ;;  %v733_v23 = vld [vmem:[#allocation5 + $0x50] sm:$0xf] }
  0x34   : > { %474 = vmatpush.bf16.msra.mxu3 %v818_v12  ;;  %v836_v24 = vld [vmem:[#allocation5 + $0x54] sm:$0xf0]  ;;  %v810_v25 = vor.u32 %v853_v20, %v807_v22  ;;  %v797_v26 = vld [vmem:[#allocation5 + $0xd0] sm:$0xf]  ;;  %v835_v28 = vld [vmem:[#allocation5 + $0x54] sm:$0xf] }
  0x35   : > { %v852_v27 = vld [vmem:[#allocation5 + $0xd4] sm:$0xf0]  ;;  %436 = vmatpush.bf16.msra.mxu0 %v742_v16  ;;  %v734_v29 = vor.u32 %v836_v24, %v733_v23  ;;  %v735_v30 = vld [vmem:[#allocation5 + $0x58] sm:$0xf0]  ;;  %v851_v31 = vld [vmem:[#allocation5 + $0xd4] sm:$0xf] }
  0x36   : > { %v799_v32 = vld [vmem:[#allocation5 + $0xd8] sm:$0xf0]  ;;  %449 = vmatpush.bf16.msra.mxu1 %v806_v17  ;;  %v798_v33 = vor.u32 %v852_v27, %v797_v26  ;;  %v738_v34 = vor.u32 %v835_v28, %v735_v30  ;;  %v725_v35 = vld [vmem:[#allocation5 + $0x40] sm:$0xf]  ;;  %v834_v36 = vld [vmem:[#allocation5 + $0x44] sm:$0xf0] }
  0x37   : > { %462 = vmatpush.bf16.msra.mxu2 %v746_v21  ;;  %v789_v37 = vld [vmem:[#allocation5 + $0xc0] sm:$0xf]  ;;  %v802_v38 = vor.u32 %v851_v31, %v799_v32  ;;  %v850_v39 = vld [vmem:[#allocation5 + $0xc4] sm:$0xf0]  ;;  %v833_v40 = vld [vmem:[#allocation5 + $0x44] sm:$0xf]  ;;  %v726_v44 = vor.u32 %v834_v36, %v725_v35 }
  0x38   : > { %475 = vmatpush.bf16.msra.mxu3 %v810_v25  ;;  %v727_v41 = vld [vmem:[#allocation5 + $0x48] sm:$0xf0]  ;;  %v849_v42 = vld [vmem:[#allocation5 + $0xc4] sm:$0xf]  ;;  %v790_v45 = vor.u32 %v850_v39, %v789_v37  ;;  %v717_v47 = vld [vmem:[#allocation5 + $0x30] sm:$0xf] }
  0x39   : > { %v791_v43 = vld [vmem:[#allocation5 + $0xc8] sm:$0xf0]  ;;  %437 = vmatpush.bf16.msra.mxu0 %v734_v29  ;;  %v730_v46 = vor.u32 %v833_v40, %v727_v41  ;;  %v832_v48 = vld [vmem:[#allocation5 + $0x34] sm:$0xf0]  ;;  %v781_v49 = vld [vmem:[#allocation5 + $0xb0] sm:$0xf] }
  0x3a   : > { %450 = vmatpush.bf16.msra.mxu1 %v798_v33  ;;  %v794_v50 = vor.u32 %v849_v42, %v791_v43  ;;  %v848_v51 = vld [vmem:[#allocation5 + $0xb4] sm:$0xf0]  ;;  %v831_v52 = vld [vmem:[#allocation5 + $0x34] sm:$0xf]  ;;  %v719_v53 = vld [vmem:[#allocation5 + $0x38] sm:$0xf0]  ;;  %v718_v56 = vor.u32 %v832_v48, %v717_v47 }
  0x3b   : > { %463 = vmatpush.bf16.msra.mxu2 %v738_v34  ;;  %v847_v54 = vld [vmem:[#allocation5 + $0xb4] sm:$0xf]  ;;  %v783_v55 = vld [vmem:[#allocation5 + $0xb8] sm:$0xf0]  ;;  %v782_v57 = vor.u32 %v848_v51, %v781_v49  ;;  %v722_v58 = vor.u32 %v831_v52, %v719_v53  ;;  %v709_v59 = vld [vmem:[#allocation5 + $0x20] sm:$0xf] }
  0x3c   : > { %476 = vmatpush.bf16.msra.mxu3 %v802_v38  ;;  %v830_v60 = vld [vmem:[#allocation5 + $0x24] sm:$0xf0]  ;;  %v773_v61 = vld [vmem:[#allocation5 + $0xa0] sm:$0xf]  ;;  %v786_v62 = vor.u32 %v847_v54, %v783_v55  ;;  %v829_v0 = vld [vmem:[#allocation5 + $0x24] sm:$0xf] }
  0x3d   : > { %438 = vmatpush.bf16.msra.mxu0 %v726_v44  ;;  %v846_v63 = vld [vmem:[#allocation5 + $0xa4] sm:$0xf0]  ;;  %v711_v1 = vld [vmem:[#allocation5 + $0x28] sm:$0xf0]  ;;  %v845_v2 = vld [vmem:[#allocation5 + $0xa4] sm:$0xf]  ;;  %v710_v4 = vor.u32 %v830_v60, %v709_v59 }
  0x3e   : > { %451 = vmatpush.bf16.msra.mxu1 %v790_v45  ;;  %v775_v3 = vld [vmem:[#allocation5 + $0xa8] sm:$0xf0]  ;;  %v701_v5 = vld [vmem:[#allocation5 + $0x10] sm:$0xf]  ;;  %v774_v6 = vor.u32 %v846_v63, %v773_v61  ;;  %v714_v7 = vor.u32 %v829_v0, %v711_v1  ;;  %v828_v8 = vld [vmem:[#allocation5 + $0x14] sm:$0xf0] }
  0x3f   : > { %464 = vmatpush.bf16.msra.mxu2 %v730_v46  ;;  %v765_v9 = vld [vmem:[#allocation5 + $0x90] sm:$0xf]  ;;  %v844_v10 = vld [vmem:[#allocation5 + $0x94] sm:$0xf0]  ;;  %v778_v11 = vor.u32 %v845_v2, %v775_v3  ;;  %v827_v12 = vld [vmem:[#allocation5 + $0x14] sm:$0xf]  ;;  %v702_v17 = vor.u32 %v828_v8, %v701_v5 }
  0x40   : > { %477 = vmatpush.bf16.msra.mxu3 %v794_v50  ;;  %v703_v13 = vld [vmem:[#allocation5 + $0x18] sm:$0xf0]  ;;  %v843_v15 = vld [vmem:[#allocation5 + $0x94] sm:$0xf]  ;;  %v766_v18 = vor.u32 %v844_v10, %v765_v9  ;;  %v693_v20 = vld [vmem:[#allocation5] sm:$0xf] }
  0x41   : > { %439 = vmatpush.bf16.msra.mxu0 %v718_v56  ;;  %v234_v14 = vld [vmem:[%s1233_s21] sm:$0xff]  ;;  %v706_v19 = vor.u32 %v827_v12, %v703_v13  ;;  %v826_v21 = vld [vmem:[#allocation5 + $0x4] sm:$0xf0]  ;;  %v757_v22 = vld [vmem:[#allocation5 + $0x80] sm:$0xf]  ;;  %s1102_s23 = smov 108  }
  0x42   : > { %452 = vmatpush.bf16.msra.mxu1 %v782_v57  ;;  %v767_v16 = vld [vmem:[#allocation5 + $0x98] sm:$0xf0]  ;;  %236 = vst [vmem:[#allocation1] ss:$2 sm:$0xff] %v234_v14  ;;  %v842_v24 = vld [vmem:[#allocation5 + $0x84] sm:$0xf0]  ;;  %v694_v29 = vor.u32 %v826_v21, %v693_v20 }
  0x43   : > { %465 = vmatpush.bf16.msra.mxu2 %v722_v58  ;;  %v770_v23 = vor.u32 %v843_v15, %v767_v16  ;;  %v825_v25 = vld [vmem:[#allocation5 + $0x4] sm:$0xf]  ;;  %v695_v26 = vld [vmem:[#allocation5 + $0x8] sm:$0xf0]  ;;  %v758_v30 = vor.u32 %v842_v24, %v757_v22  ;;  %s1103_s7 = smov 106   ;;  %s1104_s20 = smov 107  }
  0x44   : > { %478 = vmatpush.bf16.msra.mxu3 %v786_v62  ;;  %v841_v27 = vld [vmem:[#allocation5 + $0x84] sm:$0xf]  ;;  %v759_v28 = vld [vmem:[#allocation5 + $0x88] sm:$0xf0]  ;;  %v698_v31 = vor.u32 %v825_v25, %v695_v26  ;;  %s1105_s24 = smov 117   ;;  %s1106_s25 = smov 116  }
  0x45   : > { %440 = vmatpush.bf16.msra.mxu0 %v710_v4  ;;  %v762_v32 = vor.u32 %v841_v27, %v759_v28  ;;  %s1107_s26 = smov 127   ;;  %s1108_s27 = smov 126   ;;  %v556_v51 = vld [vmem:[%s1297_s3] sm:$0xff]  ;;  %v1110_v52 = vmov 0   ;;  %vm544_vm0 = vcmask 867328   ;;  %vm566_vm1 = vcmask 1041408  }
  0x46   : > { %453 = vmatpush.bf16.msra.mxu1 %v774_v6  ;;  %s1109_s28 = smov 118   ;;  %965 = vset.pattern.permute.xlu2 %v1110_v52  ;;  %vm530_vm2 = vcmask 883712   ;;  %vm516_vm3 = vcmask 957440   ;;  %vm523_vm4 = vcmask 949248   ;;  %vm537_vm5 = vcmask 875520   ;;  %s821_s13 = sshll.u32 %s1160_s22, 3 }
  0x47   : > { %466 = vmatpush.bf16.msra.mxu2 %v714_v7  ;;  %966 = vset.pattern.permute.xlu0 %v1110_v52  ;;  %vm547_vm6 = vcmask 1043456   ;;  %vm495_vm7 = vcmask 1039360   ;;  %vm502_vm8 = vcmask 1031168   ;;  %vm509_vm9 = vcmask 965632   ;;  %s1047_s30 = scalar_lea.hbm %s1298_s4, 16 }
  0x48   : > { %479 = vmatpush.bf16.msra.mxu3 %v778_v11  ;;  %vm562_vm10 = vcmask 293888  }
  0x49   : > { %441 = vmatpush.bf16.msra.mxu0 %v702_v17  ;;  %v237_v33 = vld.sshfl [vmem:[#allocation1] sm:$0xff pattern:$0x75316420]  ;;  %v238_v34 = vld.sshfl [vmem:[#allocation1 + $0x8] sm:$0xff pattern:$0x75316420] }
  0x4a   : > { %454 = vmatpush.bf16.msra.mxu1 %v766_v18  ;;  %v241_v35 = vpack.c.bf16 %v237_v33, %v237_v33  ;;  %v242_v36 = vpack.c.bf16 %v238_v34, %v238_v34 }
  0x4b   : > { %467 = vmatpush.bf16.msra.mxu2 %v706_v19 }
  0x4c   : > { %480 = vmatpush.bf16.msra.mxu3 %v770_v23 }
  0x4d   : > { %442 = vmatpush.bf16.msra.mxu0 %v694_v29  ;;  %v555_v29 = vld [vmem:[%s1296_s2] sm:$0xf] }
  0x4e   : > { %455 = vmatpush.bf16.msra.mxu1 %v758_v30 }
  0x4f   : > { %468 = vmatpush.bf16.msra.mxu2 %v698_v31 }
  0x50   : > { %481 = vmatpush.bf16.msra.mxu3 %v762_v32  ;;  %443 = vmatmul.bf16.vlgmr.msra.gmra.mxu0 %v241_v35 }
  0x51   : > { %456 = vmatmul.bf16.vlgmr.msra.gmra.mxu1 %v242_v36 }
  0x52   : > { %469 = vmatmul.bf16.vlgmr.msra.gmra.mxu2 %v241_v35 }
  0x53   : > { %482 = vmatmul.bf16.vlgmr.msra.gmra.mxu3 %v242_v36 }
  0xcd   : > { %v444_v37 = vpop.f32.mrf.mxu0 }
  0xce   : > { %v457_v38 = vpop.f32.mrf.mxu1 }
  0xcf   : > { %v1244_v39 = vadd.f32 %v457_v38, %v444_v37 }
  0xd1   : > { %v489_v45 = vrot.slane %v1244_v39, 4 }
  0xd5   : > { %v470_v40 = vpop.f32.mrf.mxu2  ;;  %v446_v42 = vpop.f32.mrf.mxu0 }
  0xd6   : > { %v483_v41 = vpop.f32.mrf.mxu3  ;;  %v459_v44 = vpop.f32.mrf.mxu1 }
  0xd7   : > { %v484_v43 = vadd.f32 %v483_v41, %v470_v40 }
  0xd9   : > { %v935_v46 = vpack.i.bf16 %v484_v43, %v1244_v39  ;;  %v490_v47 = vrot.slane %v484_v43, 4 }
  0xdb   : > { %936 = vrot.lane.b32.xlu1 %v935_v46, %s1102_s23  ;;  %926 = vrot.lane.b32.xlu0 %v935_v46, %s1103_s7  ;;  %v945_v48 = vpack.i.bf16 %v490_v47, %v489_v45  ;;  %s595_s23 = scalar_lea.hbm %s1298_s4, %s821_s13  ;;  %s232_s7 = scalar_lea.vmem [#allocation7], %s688_s14 }
  0xdd   : > { %946 = vrot.lane.b32.xlu2 %v945_v48, %s1104_s20  ;;  %v472_v49 = vpop.f32.mrf.mxu2  ;;  %s597_s20 = sshll.u32 %s232_s7, 4  ;;  %s598_s20 = int_to_ptr.vmem [resolvable:$true] %s597_s20 }
  0xde   : > { %v485_v50 = vpop.f32.mrf.mxu3 }
  0xe3   : > { %931 = vrot.lane.b32.xlu0 %v935_v46, %s1105_s24  ;;  %941 = vrot.lane.b32.xlu1 %v945_v48, %s1106_s25  ;;  %s599_s24 = sshll.u32 %s595_s23, 4  ;;  %s585_s25 = scalar_lea.sflag [#allocation4], %s1227_s9  ;;  %s600_s24 = int_to_ptr.hbm [resolvable:$true] %s599_s24 }
  0xe5   : > { %951 = vrot.lane.b32.xlu2 %v945_v48, %s1107_s26  ;;  %s1041_s26 = sshra.s32 %s600_s24, 4  ;;  %s1042_s26 = int_to_ptr.hbm [resolvable:$true] %s1041_s26 }
  0xe6   : > { %p1048_p12 = scmp.lt.s32.totalorder %s1042_s26, %s1298_s4 }
  0xeb   : > { %956 = vrot.lane.b32.xlu0 %v935_v46, %s1108_s27  ;;  %961 = vrot.lane.b32.xlu1 %v945_v48, %s1109_s28  ;;  %s1043_s27 = scalar_lea.hbm %s1042_s26, 8 }
  0xec   : > { %p1044_p1 = scmp.ne.s32.totalorder %s1042_s26, %s1043_s27  ;;  %p1049_p8 = scmp.lt.s32.totalorder %s1047_s30, %s1043_s27 }
  0xed   : > { %559 = vperm.xlu2 %965, %v556_v51  }
  0xee   : > { %p1045_p3 = pnand %p1044_p1, %p1196_p13  ;;  %p1050_p7 = por %p1049_p8, %p1048_p12 }
  0xf0   : > { %p1046_p5 = pneg %p1045_p3 }
  0xf2   : > { %p1051_p9 = pnand %p1050_p7, %p1046_p5 }
 0x137   : > { %v947_v53 = vpop.permute.xlu2 %946 }
 0x138   : > { %v949_v63 = vunpack.i.h.bf16 %v947_v53  ;;  %v948_v0 = vunpack.i.l.bf16 %v947_v53 }
 0x13a   : > { %v538_v11 = vsel %vm537_vm5, %v948_v0, %v949_v63 }
 0x13f   : > { %v952_v4 = vpop.permute.xlu2 %951 }
 0x140   : > { %v954_v12 = vunpack.i.h.bf16 %v952_v4  ;;  %v953_v13 = vunpack.i.l.bf16 %v952_v4 }
 0x142   : > { %v496_v19 = vsel %vm495_vm7, %v953_v13, %v954_v12 }
 0x143   : > { %v548_v26 = vsel %vm547_vm6, %v1244_v39, %v496_v19 }
 0x147   : > { %v560_v30 = vpop.permute.xlu2 %559 }
 0x14d   : > { %v937_v54 = vpop.permute.xlu1 %936  ;;  %v927_v55 = vpop.permute.xlu0 %926 }
 0x14e   : > { %v929_v56 = vunpack.i.h.bf16 %v927_v55  ;;  %v928_v57 = vunpack.i.l.bf16 %v927_v55  ;;  %v939_v59 = vunpack.i.h.bf16 %v937_v54  ;;  %v938_v60 = vunpack.i.l.bf16 %v937_v54 }
 0x150   : > { %v545_v58 = vsel %vm544_vm0, %v928_v57, %v929_v56  ;;  %v531_v3 = vsel %vm530_vm2, %v938_v60, %v939_v59 }
 0x151   : > { %v554_v61 = vpack.c.bf16 %v545_v58, %v545_v58  ;;  %v551_v15 = vsel %vm547_vm6, %v531_v3, %v538_v11 }
 0x153   : > { %v568_v62 = vsel %vm566_vm1, %v554_v61, 0 }
 0x154   : > { %575 = vmatpush.bf16.msrb.mxu0 %v568_v62 }
 0x155   : > { %v932_v1 = vpop.permute.xlu0 %931  ;;  %v942_v2 = vpop.permute.xlu1 %941 }
 0x156   : > { %v934_v5 = vunpack.i.h.bf16 %v932_v1  ;;  %v933_v6 = vunpack.i.l.bf16 %v932_v1  ;;  %v944_v7 = vunpack.i.h.bf16 %v942_v2  ;;  %v943_v8 = vunpack.i.l.bf16 %v942_v2 }
 0x158   : > { %v517_v9 = vsel %vm516_vm3, %v933_v6, %v934_v5  ;;  %v524_v10 = vsel %vm523_vm4, %v943_v8, %v944_v7 }
 0x159   : > { %v550_v14 = vsel %vm547_vm6, %v517_v9, %v524_v10 }
 0x15a   : > { %v553_v16 = vpack.c.bf16 %v551_v15, %v550_v14 }
 0x15c   : > { %576 = vmatpush.bf16.msrb.mxu0 %v553_v16 }
 0x15d   : > { %v957_v17 = vpop.permute.xlu0 %956  ;;  %v962_v18 = vpop.permute.xlu1 %961 }
 0x15e   : > { %v959_v20 = vunpack.i.h.bf16 %v957_v17  ;;  %v958_v21 = vunpack.i.l.bf16 %v957_v17  ;;  %v964_v22 = vunpack.i.h.bf16 %v962_v18  ;;  %v963_v23 = vunpack.i.l.bf16 %v962_v18 }
 0x160   : > { %v503_v24 = vsel %vm502_vm8, %v958_v21, %v959_v20  ;;  %v510_v25 = vsel %vm509_vm9, %v963_v23, %v964_v22 }
 0x161   : > { %v549_v27 = vsel %vm547_vm6, %v503_v24, %v510_v25 }
 0x162   : > { %v552_v28 = vpack.c.bf16 %v549_v27, %v548_v26 }
 0x164   : > { %577 = vmatpush.bf16.msrb.mxu0 %v552_v28 }
 0x167   : > { %819 = vmatmul.msk.bf16.vlgmr.msrb.gmra.mxu0 %vm562_vm10, %v555_v29 }
 0x1e4   : > { %v579_v31 = vpop.f32.mrf.mxu0 }
 0x1e5   : > { %v580_v32 = vadd.f32 %v579_v31, %v560_v30 }
 0x1e7   : > { %583 = vst [vmem:[%s232_s7] sm:$0xff] %v580_v32 }
 0x1e8   : > { %1054 = shalt.err (!%p1051_p9)
}
 0x1e9   : > { %863 = dma.vmem_to_hbm [thread:$0]  (%p1196_p13), %s598_s20, 128, %s600_s24, %s585_s25  }
 0x1ec   : > { %v581_v33 = vpop.f32.mrf.mxu0 }
 0x1ed PF: > { %s611_s9 = sand.u32 1, %s1085_s15   ;;  %p1304_p10 = scmp.ge.s32.totalorder %s1097_s18, 2 }
 0x1ee   : > { %s612_s11 = scalar_lea.sflag [#allocation4], %s611_s9 }
 0x1ef   : > { %p874_p11 = pnand %p1304_p10, %p1201_p4 }
 0x1f1   : > { %p875_p0 = pneg %p874_p11 }
 0x1f3   : > { %1080 = dma.done.wait (%p875_p0), %s612_s11, 128  }
 0x1f4   : > { %1082 = vsyncadd (%p875_p0), %s612_s11, 4294967168  ;;  %p18_p2 = scmp.ge.s32.totalorder %s1176_s29, 4   ;;  %s1305_s15 = smov %s1089_s16 }
 0x1f5   : > { %s1306_s16 = smov %s1093_s17  ;;  %s1307_s17 = smov %s1188_s6 }
 0x1f6   : > { %s1308_s18 = smov %s1176_s29  ;;  %20 = sbr.rel (!%p18_p2) target bundleno = 6 (0x6), region = 85 }
 0x1fb   :  { %618 = vsyncpa [#allocation3], 1 }
 0x1fc   :  { %620 = vsyncpa [#allocation3 + $0x1], 1 }
 0x1fd   :  { %621 = vsyncpa [#allocation6], 1 }
 0x1fe   :  { %622 = vsyncpa [#allocation4], 1 }
 0x1ff   :  { %624 = vsyncpa [#allocation4 + $0x1], 1 }

</bundles_post_ra>
